<compile_context>
chip_gen: v5e
topology: v5e:2x2
jax: 0.10.0
libtpu: 0.0.40
codegen_flags: <defaults>
</compile_context>

<pallas_src>
import jax
import jax.numpy as jnp
import numpy as np
from jax.experimental import pallas as pl
from jax.experimental.pallas import tpu as pltpu

EPS = 1e-5


def _make_kernel(N, H, W, Cin, Cout):
    inv_nhw = 1.0 / float(N * H * W)

    def kernel(x_ref, sprev_ref, snext_ref,
               m1_ref, g1_ref, b1_ref,
               m2_ref, g2_ref, b2_ref,
               tchan_ref, o_ref):
        # x_ref        : (N*H, W*Cin)        lane-dense input slab
        # sprev/snext  : (N*H, N*H)          row-shift matrices (zero rows at image edges)
        # m1_ref       : (3*W*Cin,  W*Cout)  block-Toeplitz conv1 weights (dx & Cin in K)
        # m2_ref       : (3*W*Cout, W*Cout)  block-Toeplitz conv2 weights
        # g*/b*        : (1, W*Cout)         BN gamma/beta tiled across W
        # tchan_ref    : (W*Cout, W*Cout)    0/1 channel-group reduce+broadcast matrix
        # o_ref        : (N*H, W*Cout)
        x = x_ref[...]
        sprev = sprev_ref[...]
        snext = snext_ref[...]
        tchan = tchan_ref[...]

        def conv3x3(a, m_ref):
            # rows h-1 / h / h+1 (zero-padded at image edges via sprev/snext),
            # concatenated along the contraction dim -> one big MXU matmul.
            a_up = jnp.dot(sprev, a, preferred_element_type=jnp.float32)
            a_dn = jnp.dot(snext, a, preferred_element_type=jnp.float32)
            patches = jnp.concatenate([a_up, a, a_dn], axis=1)      # (N*H, 3*W*C)
            return jnp.dot(patches, m_ref[...], preferred_element_type=jnp.float32)

        def batchnorm(acc, g, b):
            # Single-pass batch stats: column sums / sums-of-squares over rows,
            # then per-channel reduce across W lane-groups (and broadcast back)
            # via the `tchan` matmul.  All math stays in f32.
            col_sum = jnp.sum(acc, axis=0, keepdims=True)            # (1, W*Cout)
            col_sq = jnp.sum(acc * acc, axis=0, keepdims=True)       # (1, W*Cout)
            mean = jnp.dot(col_sum, tchan, preferred_element_type=jnp.float32) * inv_nhw
            ex2 = jnp.dot(col_sq, tchan, preferred_element_type=jnp.float32) * inv_nhw
            var = jnp.maximum(ex2 - mean * mean, 0.0)                # biased variance
            return (acc - mean) * jax.lax.rsqrt(var + EPS) * g + b

        # conv1 -> bn1 -> relu
        acc1 = conv3x3(x, m1_ref)
        y1 = jnp.maximum(batchnorm(acc1, g1_ref[...], b1_ref[...]), 0.0)

        # conv2 -> bn2
        acc2 = conv3x3(y1, m2_ref)
        y2 = batchnorm(acc2, g2_ref[...], b2_ref[...])

        # residual add (identity == input slab) -> relu; lane-dense unmasked store
        o_ref[...] = jnp.maximum(y2 + x, 0.0).astype(o_ref.dtype)

    return kernel


def _conv_toeplitz(w_hwio, W):
    """HWIO (3,3,Cin,Cout) -> (3*W*Cin, W*Cout) block-Toeplitz matrix that folds
    the horizontal taps (dx), the input channels and the W-direction zero
    padding into the matmul contraction dimension (one row-block per dy)."""
    kh, kw, cin, cout = w_hwio.shape
    m = jnp.zeros((kh, W * cin, W * cout), w_hwio.dtype)
    for dx in range(kw):
        for wo in range(W):
            wi = wo + dx - 1
            if 0 <= wi < W:
                m = m.at[:, wi * cin:(wi + 1) * cin,
                         wo * cout:(wo + 1) * cout].set(w_hwio[:, dx])
    return m.reshape(kh * W * cin, W * cout)


def _row_shift_matrices(N, H):
    """(N*H, N*H) matrices selecting row h-1 / h+1 within each image; zero rows
    at image boundaries implement the conv's zero padding along H."""
    NH = N * H
    r = np.arange(NH)
    h = r % H
    sprev = np.zeros((NH, NH), np.float32)
    snext = np.zeros((NH, NH), np.float32)
    sprev[r[h > 0], r[h > 0] - 1] = 1.0
    snext[r[h < H - 1], r[h < H - 1] + 1] = 1.0
    return jnp.asarray(sprev), jnp.asarray(snext)


def basic_block_forward(x_nchw, params):
    """x_nchw: (N, C, H, W) float32. Returns (N, C, H, W). Training-mode BN."""
    w1, g1, b1, w2, g2, b2 = params
    N, C, H, W = x_nchw.shape
    Cout = w1.shape[-1]
    assert C == Cout, "identity path requires in_channels == out_channels"

    # NCHW -> lane-dense (N*H, W*C) slab
    x = jnp.transpose(x_nchw, (0, 2, 3, 1)).reshape(N * H, W * C)

    m1 = _conv_toeplitz(w1, W)                     # (3*W*C,    W*Cout)
    m2 = _conv_toeplitz(w2, W)                     # (3*W*Cout, W*Cout)
    sprev, snext = _row_shift_matrices(N, H)

    g1t = jnp.tile(g1, W).reshape(1, W * Cout)
    b1t = jnp.tile(b1, W).reshape(1, W * Cout)
    g2t = jnp.tile(g2, W).reshape(1, W * Cout)
    b2t = jnp.tile(b2, W).reshape(1, W * Cout)

    ch = np.arange(W * Cout) % Cout
    tchan = jnp.asarray((ch[:, None] == ch[None, :]).astype(np.float32))

    kernel = _make_kernel(N, H, W, C, Cout)
    out = pl.pallas_call(
        kernel,
        out_shape=jax.ShapeDtypeStruct((N * H, W * Cout), jnp.float32),
        in_specs=[pl.BlockSpec(memory_space=pltpu.MemorySpace.VMEM)] * 10,
        out_specs=pl.BlockSpec(memory_space=pltpu.MemorySpace.VMEM),
    )(x, sprev, snext, m1, g1t, b1t, m2, g2t, b2t, tchan)

    # (N*H, W*Cout) -> NCHW
    return jnp.transpose(out.reshape(N, H, W, Cout), (0, 3, 1, 2))


def reference_forward(x_nchw, params):
    """Pure-JAX reference matching PyTorch training-mode BasicBlock."""
    w1, g1, b1, w2, g2, b2 = params

    def conv(x, w):
        return jax.lax.conv_general_dilated(
            x, w, window_strides=(1, 1), padding=((1, 1), (1, 1)),
            dimension_numbers=('NCHW', 'HWIO', 'NCHW'))

    def bn(x, g, b):
        mean = jnp.mean(x, axis=(0, 2, 3), keepdims=True)
        var = jnp.mean((x - mean) ** 2, axis=(0, 2, 3), keepdims=True)
        return ((x - mean) * jax.lax.rsqrt(var + EPS)
                * g.reshape(1, -1, 1, 1) + b.reshape(1, -1, 1, 1))

    out = jax.nn.relu(bn(conv(x_nchw, w1), g1, b1))
    out = bn(conv(out, w2), g2, b2)
    return jax.nn.relu(out + x_nchw)


if __name__ == "__main__":
    key = jax.random.PRNGKey(0)
    kx, k1, k2, kg1, kb1, kg2, kb2 = jax.random.split(key, 7)

    N, C, H, W = 2, 8, 16, 16                      # W*C = 128 -> lane-dense slab
    x = jax.random.normal(kx, (N, C, H, W), jnp.float32)
    w1 = 0.1 * jax.random.normal(k1, (3, 3, C, C), jnp.float32)   # HWIO
    w2 = 0.1 * jax.random.normal(k2, (3, 3, C, C), jnp.float32)
    g1 = 1.0 + 0.1 * jax.random.normal(kg1, (C,), jnp.float32)
    b1 = 0.1 * jax.random.normal(kb1, (C,), jnp.float32)
    g2 = 1.0 + 0.1 * jax.random.normal(kg2, (C,), jnp.float32)
    b2 = 0.1 * jax.random.normal(kb2, (C,), jnp.float32)
    params = (w1, g1, b1, w2, g2, b2)

    out = basic_block_forward(x, params)
    jax.block_until_ready(out)

    ref = reference_forward(x, params)
    assert out.shape == (N, C, H, W)
    np.testing.assert_allclose(np.asarray(out), np.asarray(ref),
                               atol=1e-2, rtol=1e-2)
    print("KERNEL_OK")
</pallas_src>

<mosaic_0001>
module attributes {stable_mosaic.version = 11 : i64} {
  func.func @kernel(%arg0: memref<32x128xf32, #tpu.memory_space<vmem>>, %arg1: memref<32x32xf32, #tpu.memory_space<vmem>>, %arg2: memref<32x32xf32, #tpu.memory_space<vmem>>, %arg3: memref<384x128xf32, #tpu.memory_space<vmem>>, %arg4: memref<1x128xf32, #tpu.memory_space<vmem>>, %arg5: memref<1x128xf32, #tpu.memory_space<vmem>>, %arg6: memref<384x128xf32, #tpu.memory_space<vmem>>, %arg7: memref<1x128xf32, #tpu.memory_space<vmem>>, %arg8: memref<1x128xf32, #tpu.memory_space<vmem>>, %arg9: memref<128x128xf32, #tpu.memory_space<vmem>>, %arg10: memref<32x128xf32, #tpu.memory_space<vmem>>) attributes {dimension_semantics = [], scalar_prefetch = 0 : i64, scratch_operands = 0 : i64, tpu.core_type = #tpu.core_type<tc>} {
    %c0 = arith.constant 0 : index
    %c0_0 = arith.constant 0 : index
    %0 = vector.load %arg0[%c0, %c0_0] : memref<32x128xf32, #tpu.memory_space<vmem>>, vector<32x128xf32>
    %c0_1 = arith.constant 0 : index
    %c0_2 = arith.constant 0 : index
    %1 = vector.load %arg1[%c0_1, %c0_2] : memref<32x32xf32, #tpu.memory_space<vmem>>, vector<32x32xf32>
    %c0_3 = arith.constant 0 : index
    %c0_4 = arith.constant 0 : index
    %2 = vector.load %arg2[%c0_3, %c0_4] : memref<32x32xf32, #tpu.memory_space<vmem>>, vector<32x32xf32>
    %c0_5 = arith.constant 0 : index
    %c0_6 = arith.constant 0 : index
    %3 = vector.load %arg9[%c0_5, %c0_6] : memref<128x128xf32, #tpu.memory_space<vmem>>, vector<128x128xf32>
    %cst = arith.constant dense<0.000000e+00> : vector<32x128xf32>
    %4 = tpu.matmul %1, %0, %cst {dimension_numbers = #tpu.dot_dimension_numbers<[1], [0], [0], [1], [0, 0, 1, 1], [], []>} : vector<32x32xf32>, vector<32x128xf32>, vector<32x128xf32> -> vector<32x128xf32>
    %cst_7 = arith.constant dense<0.000000e+00> : vector<32x128xf32>
    %5 = tpu.matmul %2, %0, %cst_7 {dimension_numbers = #tpu.dot_dimension_numbers<[1], [0], [0], [1], [0, 0, 1, 1], [], []>} : vector<32x32xf32>, vector<32x128xf32>, vector<32x128xf32> -> vector<32x128xf32>
    %6 = tpu.concatenate %4, %0, %5 in 1 : vector<32x128xf32>, vector<32x128xf32>, vector<32x128xf32> -> vector<32x384xf32>
    %c0_8 = arith.constant 0 : index
    %c0_9 = arith.constant 0 : index
    %7 = vector.load %arg3[%c0_8, %c0_9] : memref<384x128xf32, #tpu.memory_space<vmem>>, vector<384x128xf32>
    %cst_10 = arith.constant dense<0.000000e+00> : vector<32x128xf32>
    %8 = tpu.matmul %6, %7, %cst_10 {dimension_numbers = #tpu.dot_dimension_numbers<[1], [0], [0], [1], [0, 0, 1, 1], [], []>} : vector<32x384xf32>, vector<384x128xf32>, vector<32x128xf32> -> vector<32x128xf32>
    %c0_11 = arith.constant 0 : index
    %c0_12 = arith.constant 0 : index
    %9 = vector.load %arg4[%c0_11, %c0_12] : memref<1x128xf32, #tpu.memory_space<vmem>>, vector<1x128xf32>
    %c0_13 = arith.constant 0 : index
    %c0_14 = arith.constant 0 : index
    %10 = vector.load %arg5[%c0_13, %c0_14] : memref<1x128xf32, #tpu.memory_space<vmem>>, vector<1x128xf32>
    %cst_15 = arith.constant dense<0.000000e+00> : vector<128xf32>
    %11 = vector.multi_reduction <add>, %8, %cst_15 [0] : vector<32x128xf32> to vector<128xf32>
    %12 = vector.shape_cast %11 : vector<128xf32> to vector<1x128xf32>
    %13 = arith.mulf %8, %8 : vector<32x128xf32>
    %cst_16 = arith.constant dense<0.000000e+00> : vector<128xf32>
    %14 = vector.multi_reduction <add>, %13, %cst_16 [0] : vector<32x128xf32> to vector<128xf32>
    %15 = vector.shape_cast %14 : vector<128xf32> to vector<1x128xf32>
    %cst_17 = arith.constant dense<0.000000e+00> : vector<1x128xf32>
    %16 = tpu.matmul %12, %3, %cst_17 {dimension_numbers = #tpu.dot_dimension_numbers<[1], [0], [0], [1], [0, 0, 1, 1], [], []>} : vector<1x128xf32>, vector<128x128xf32>, vector<1x128xf32> -> vector<1x128xf32>
    %cst_18 = arith.constant 0.001953125 : f32
    %17 = vector.broadcast %cst_18 : f32 to vector<1x128xf32>
    %18 = arith.mulf %16, %17 : vector<1x128xf32>
    %cst_19 = arith.constant dense<0.000000e+00> : vector<1x128xf32>
    %19 = tpu.matmul %15, %3, %cst_19 {dimension_numbers = #tpu.dot_dimension_numbers<[1], [0], [0], [1], [0, 0, 1, 1], [], []>} : vector<1x128xf32>, vector<128x128xf32>, vector<1x128xf32> -> vector<1x128xf32>
    %cst_20 = arith.constant 0.001953125 : f32
    %20 = vector.broadcast %cst_20 : f32 to vector<1x128xf32>
    %21 = arith.mulf %19, %20 : vector<1x128xf32>
    %22 = arith.mulf %18, %18 : vector<1x128xf32>
    %23 = arith.subf %21, %22 : vector<1x128xf32>
    %cst_21 = arith.constant 0.000000e+00 : f32
    %24 = vector.broadcast %cst_21 : f32 to vector<1x128xf32>
    %25 = arith.maximumf %23, %24 : vector<1x128xf32>
    %26 = vector.broadcast %18 : vector<1x128xf32> to vector<32x128xf32>
    %27 = arith.subf %8, %26 : vector<32x128xf32>
    %cst_22 = arith.constant 9.99999974E-6 : f32
    %28 = vector.broadcast %cst_22 : f32 to vector<1x128xf32>
    %29 = arith.addf %25, %28 : vector<1x128xf32>
    %30 = math.rsqrt %29 : vector<1x128xf32>
    %31 = vector.broadcast %30 : vector<1x128xf32> to vector<32x128xf32>
    %32 = arith.mulf %27, %31 : vector<32x128xf32>
    %33 = vector.broadcast %9 : vector<1x128xf32> to vector<32x128xf32>
    %34 = arith.mulf %32, %33 : vector<32x128xf32>
    %35 = vector.broadcast %10 : vector<1x128xf32> to vector<32x128xf32>
    %36 = arith.addf %34, %35 : vector<32x128xf32>
    %cst_23 = arith.constant 0.000000e+00 : f32
    %37 = vector.broadcast %cst_23 : f32 to vector<32x128xf32>
    %38 = arith.maximumf %36, %37 : vector<32x128xf32>
    %cst_24 = arith.constant dense<0.000000e+00> : vector<32x128xf32>
    %39 = tpu.matmul %1, %38, %cst_24 {dimension_numbers = #tpu.dot_dimension_numbers<[1], [0], [0], [1], [0, 0, 1, 1], [], []>} : vector<32x32xf32>, vector<32x128xf32>, vector<32x128xf32> -> vector<32x128xf32>
    %cst_25 = arith.constant dense<0.000000e+00> : vector<32x128xf32>
    %40 = tpu.matmul %2, %38, %cst_25 {dimension_numbers = #tpu.dot_dimension_numbers<[1], [0], [0], [1], [0, 0, 1, 1], [], []>} : vector<32x32xf32>, vector<32x128xf32>, vector<32x128xf32> -> vector<32x128xf32>
    %41 = tpu.concatenate %39, %38, %40 in 1 : vector<32x128xf32>, vector<32x128xf32>, vector<32x128xf32> -> vector<32x384xf32>
    %c0_26 = arith.constant 0 : index
    %c0_27 = arith.constant 0 : index
    %42 = vector.load %arg6[%c0_26, %c0_27] : memref<384x128xf32, #tpu.memory_space<vmem>>, vector<384x128xf32>
    %cst_28 = arith.constant dense<0.000000e+00> : vector<32x128xf32>
    %43 = tpu.matmul %41, %42, %cst_28 {dimension_numbers = #tpu.dot_dimension_numbers<[1], [0], [0], [1], [0, 0, 1, 1], [], []>} : vector<32x384xf32>, vector<384x128xf32>, vector<32x128xf32> -> vector<32x128xf32>
    %c0_29 = arith.constant 0 : index
    %c0_30 = arith.constant 0 : index
    %44 = vector.load %arg7[%c0_29, %c0_30] : memref<1x128xf32, #tpu.memory_space<vmem>>, vector<1x128xf32>
    %c0_31 = arith.constant 0 : index
    %c0_32 = arith.constant 0 : index
    %45 = vector.load %arg8[%c0_31, %c0_32] : memref<1x128xf32, #tpu.memory_space<vmem>>, vector<1x128xf32>
    %cst_33 = arith.constant dense<0.000000e+00> : vector<128xf32>
    %46 = vector.multi_reduction <add>, %43, %cst_33 [0] : vector<32x128xf32> to vector<128xf32>
    %47 = vector.shape_cast %46 : vector<128xf32> to vector<1x128xf32>
    %48 = arith.mulf %43, %43 : vector<32x128xf32>
    %cst_34 = arith.constant dense<0.000000e+00> : vector<128xf32>
    %49 = vector.multi_reduction <add>, %48, %cst_34 [0] : vector<32x128xf32> to vector<128xf32>
    %50 = vector.shape_cast %49 : vector<128xf32> to vector<1x128xf32>
    %cst_35 = arith.constant dense<0.000000e+00> : vector<1x128xf32>
    %51 = tpu.matmul %47, %3, %cst_35 {dimension_numbers = #tpu.dot_dimension_numbers<[1], [0], [0], [1], [0, 0, 1, 1], [], []>} : vector<1x128xf32>, vector<128x128xf32>, vector<1x128xf32> -> vector<1x128xf32>
    %cst_36 = arith.constant 0.001953125 : f32
    %52 = vector.broadcast %cst_36 : f32 to vector<1x128xf32>
    %53 = arith.mulf %51, %52 : vector<1x128xf32>
    %cst_37 = arith.constant dense<0.000000e+00> : vector<1x128xf32>
    %54 = tpu.matmul %50, %3, %cst_37 {dimension_numbers = #tpu.dot_dimension_numbers<[1], [0], [0], [1], [0, 0, 1, 1], [], []>} : vector<1x128xf32>, vector<128x128xf32>, vector<1x128xf32> -> vector<1x128xf32>
    %cst_38 = arith.constant 0.001953125 : f32
    %55 = vector.broadcast %cst_38 : f32 to vector<1x128xf32>
    %56 = arith.mulf %54, %55 : vector<1x128xf32>
    %57 = arith.mulf %53, %53 : vector<1x128xf32>
    %58 = arith.subf %56, %57 : vector<1x128xf32>
    %cst_39 = arith.constant 0.000000e+00 : f32
    %59 = vector.broadcast %cst_39 : f32 to vector<1x128xf32>
    %60 = arith.maximumf %58, %59 : vector<1x128xf32>
    %61 = vector.broadcast %53 : vector<1x128xf32> to vector<32x128xf32>
    %62 = arith.subf %43, %61 : vector<32x128xf32>
    %cst_40 = arith.constant 9.99999974E-6 : f32
    %63 = vector.broadcast %cst_40 : f32 to vector<1x128xf32>
    %64 = arith.addf %60, %63 : vector<1x128xf32>
    %65 = math.rsqrt %64 : vector<1x128xf32>
    %66 = vector.broadcast %65 : vector<1x128xf32> to vector<32x128xf32>
    %67 = arith.mulf %62, %66 : vector<32x128xf32>
    %68 = vector.broadcast %44 : vector<1x128xf32> to vector<32x128xf32>
    %69 = arith.mulf %67, %68 : vector<32x128xf32>
    %70 = vector.broadcast %45 : vector<1x128xf32> to vector<32x128xf32>
    %71 = arith.addf %69, %70 : vector<32x128xf32>
    %72 = arith.addf %71, %0 : vector<32x128xf32>
    %cst_41 = arith.constant 0.000000e+00 : f32
    %73 = vector.broadcast %cst_41 : f32 to vector<32x128xf32>
    %74 = arith.maximumf %72, %73 : vector<32x128xf32>
    %c0_42 = arith.constant 0 : index
    %c0_43 = arith.constant 0 : index
    %75 = vector.load %arg10[%c0_42, %c0_43] : memref<32x128xf32, #tpu.memory_space<vmem>>, vector<32x128xf32>
    tpu.vector_store %arg10[%c0_42, %c0_43], %74 {strides = array<i32>} : memref<32x128xf32, #tpu.memory_space<vmem>>, vector<32x128xf32>,
    return
  }
}

</mosaic_0001>

<bundles_post_ra>
// kernel: tpu_custom_call.1
= control target key start
LH: loop header
LB: loop body
LE: loop exit
PB: predicated region body
PF: predicated region fallthrough
CT: control target
= control target key end

     0   :  { %15 = vsyncpa [#allocation3], 0  ;;  %s1332_s0 = inlined_call_operand.hbm [shape: f32[32,128], index: 0, kind: input, shape index: {}]   ;;  %s1333_s1 = inlined_call_operand.hbm [shape: f32[32,32], index: 1, kind: input, shape index: {}]   ;;  %s1334_s2 = inlined_call_operand.hbm [shape: f32[32,32], index: 2, kind: input, shape index: {}]   ;;  %s1335_s3 = inlined_call_operand.hbm [shape: f32[384,128], index: 3, kind: input, shape index: {}]   ;;  %s1336_s4 = inlined_call_operand.vmem [shape: f32[1,128], index: 4, kind: input, shape index: {}]   ;;  %s1337_s5 = inlined_call_operand.vmem [shape: f32[1,128], index: 5, kind: input, shape index: {}]   ;;  %s1338_s6 = inlined_call_operand.hbm [shape: f32[384,128], index: 6, kind: input, shape index: {}]   ;;  %s1339_s7 = inlined_call_operand.vmem [shape: f32[1,128], index: 7, kind: input, shape index: {}]   ;;  %s1340_s8 = inlined_call_operand.vmem [shape: f32[1,128], index: 8, kind: input, shape index: {}]   ;;  %s1341_s9 = inlined_call_operand.hbm [shape: f32[128,128], index: 9, kind: input, shape index: {}]   ;;  %s1342_s10 = inlined_call_operand.hbm [shape: f32[32,128], index: 10, kind: output, shape index: {}]  }
   0x1   :  { %16 = vsyncpa [#allocation6], 0 }
   0x2   :  { %17 = vsyncpa [#allocation9], 0 }
   0x3   :  { %18 = vsyncpa [#allocation12], 0 }
   0x4   :  { %19 = vsyncpa [#allocation4], 0  ;;  %s37_s15 = sshll.u32 %s1333_s1, 4  ;;  %s1030_s16 = smov [#allocation5]   ;;  %s38_s15 = int_to_ptr.hbm [resolvable:$true] %s37_s15 }
   0x5   :  { %s39_s17 = sshll.u32 %s1030_s16, 4  ;;  %s63_s20 = sshll.u32 %s1335_s3, 4  ;;  %s40_s17 = int_to_ptr.vmem [resolvable:$true] %s39_s17  ;;  %s64_s20 = int_to_ptr.hbm [resolvable:$true] %s63_s20 }
   0x6   :  { %s1031_s21 = smov 128   ;;  %s1032_s22 = smov 8  }
   0x7   :  { %45 = dma.hbm_to_vmem [thread:$0]  %s38_s15, 512, %s40_s17, [#allocation6], %s1031_s21, %s1031_s21, %s1032_s22  }
   0x8   :  { %s1033_s23 = smov [#allocation8]   ;;  %s24_s1 = sshll.u32 %s1332_s0, 4  ;;  %s25_s1 = int_to_ptr.hbm [resolvable:$true] %s24_s1 }
   0x9   :  { %s65_s24 = sshll.u32 %s1033_s23, 4  ;;  %s50_s28 = sshll.u32 %s1334_s2, 4  ;;  %s66_s24 = int_to_ptr.vmem [resolvable:$true] %s65_s24  ;;  %s51_s28 = int_to_ptr.hbm [resolvable:$true] %s50_s28 }
   0xa   :  { %71 = dma.hbm_to_vmem [thread:$0]  %s64_s20, 6144, %s66_s24, [#allocation9], %s1031_s21, %s1031_s21, %s1032_s22  }
   0xb   :  { %s1034_s29 = smov [#allocation2]   ;;  %s1035_s11 = smov [#allocation7]  }
   0xc   :  { %s26_s30 = sshll.u32 %s1034_s29, 4  ;;  %s52_s0 = sshll.u32 %s1035_s11, 4  ;;  %s27_s30 = int_to_ptr.vmem [resolvable:$true] %s26_s30  ;;  %s53_s0 = int_to_ptr.vmem [resolvable:$true] %s52_s0 }
   0xd   :  { %32 = dma.hbm_to_vmem [thread:$0]  %s25_s1, 512, %s27_s30, [#allocation3], %s1031_s21, %s1031_s21, %s1032_s22  }
   0xe   :  { %s80_s14 = sshll.u32 %s1338_s6, 4  ;;  %s97_s16 = sshll.u32 %s1341_s9, 4  ;;  %s81_s14 = int_to_ptr.hbm [resolvable:$true] %s80_s14  ;;  %s98_s16 = int_to_ptr.hbm [resolvable:$true] %s97_s16 }
   0xf   :  { %58 = dma.hbm_to_vmem [thread:$0]  %s51_s28, 512, %s53_s0, [#allocation6], %s1031_s21, %s1031_s21, %s1032_s22  }
  0x10   :  { %s1036_s17 = smov [#allocation10]   ;;  %s1037_s19 = smov [#allocation11]  }
  0x11   :  { %s82_s18 = sshll.u32 %s1036_s17, 4  ;;  %s99_s6 = sshll.u32 %s1037_s19, 4  ;;  %s83_s18 = int_to_ptr.vmem [resolvable:$true] %s82_s18  ;;  %s100_s6 = int_to_ptr.vmem [resolvable:$true] %s99_s6 }
  0x12   :  { %88 = dma.hbm_to_vmem [thread:$0]  %s81_s14, 6144, %s83_s18, [#allocation9], %s1031_s21, %s1031_s21, %s1032_s22  }
  0x13   :  { %105 = dma.hbm_to_vmem [thread:$0]  %s98_s16, 2048, %s100_s6, [#allocation12], %s1031_s21, %s1031_s21, %s1032_s22  }
  0x14   :  { %1020 = dma.done.wait [#allocation3], 512  }
  0x15   :  { %1021 = vsyncadd [#allocation3], 4294966784 }
  0x16   :  { %1022 = dma.done.wait [#allocation6], 1024  }
  0x17   :  { %1023 = vsyncadd [#allocation6], 4294966272 }
  0x18   :  { %1024 = dma.done.wait [#allocation9], 12288  }
  0x19   :  { %1025 = vsyncadd [#allocation9], 4294955008 }
  0x1a   :  { %1026 = dma.done.wait [#allocation12], 2048  }
  0x1b   :  { %1027 = vsyncadd [#allocation12], 4294965248  ;;  %v1130_v0 = vld [vmem:[#allocation2 + $0x18] sm:$0xff]  ;;  %v1132_v1 = vld [vmem:[#allocation2 + $0x10] sm:$0xff]  ;;  %vm158_vm0 = vcmask 261120   ;;  %s799_s27 = sshll.u32 %s1342_s10, 4  ;;  %s800_s27 = int_to_ptr.hbm [resolvable:$true] %s799_s27 }
  0x1c   :  { %183 = vmatpush.msra.mxu2 %v1130_v0  ;;  %224 = vmatpush.msra.mxu1 %v1130_v0  ;;  %v1136_v2 = vld [vmem:[#allocation2 + $0x8] sm:$0xff]  ;;  %v1140_v3 = vld [vmem:[#allocation2] sm:$0xff]  ;;  %v272_v4 = vld [vmem:[#allocation8 + $0xf8] sm:$0xff] }
  0x1d   :  { %v1143_v5 = vld [vmem:[#allocation5] sm:$0xff]  ;;  %v256_v7 = vld [vmem:[#allocation8 + $0x78] sm:$0xff]  ;;  %318 = vmatpush.msra.mxu3 %v272_v4  ;;  %v271_v8 = vld [vmem:[#allocation8 + $0xf0] sm:$0xff] }
  0x1e   :  { %184 = vmatpush.msra.mxu2 %v1132_v1  ;;  %225 = vmatpush.msra.mxu1 %v1132_v1  ;;  %v1146_v6 = vld [vmem:[#allocation7] sm:$0xff]  ;;  %v288_v9 = vld [vmem:[#allocation8 + $0x178] sm:$0xff]  ;;  %v255_v10 = vld [vmem:[#allocation8 + $0x70] sm:$0xff] }
  0x1f   :  { %v270_v11 = vld [vmem:[#allocation8 + $0xe8] sm:$0xff]  ;;  %319 = vmatpush.msra.mxu3 %v271_v8  ;;  %v287_v12 = vld [vmem:[#allocation8 + $0x170] sm:$0xff]  ;;  %v269_v14 = vld [vmem:[#allocation8 + $0xe0] sm:$0xff]  ;;  %347 = vmatpush.msra.mxu0 %v288_v9 }
  0x20   :  { %185 = vmatpush.msra.mxu2 %v1136_v2  ;;  %226 = vmatpush.msra.mxu1 %v1136_v2  ;;  %v254_v13 = vld [vmem:[#allocation8 + $0x68] sm:$0xff]  ;;  %v253_v16 = vld [vmem:[#allocation8 + $0x60] sm:$0xff]  ;;  %v268_v17 = vld [vmem:[#allocation8 + $0xd8] sm:$0xff] }
  0x21   :  { %320 = vmatpush.msra.mxu3 %v270_v11  ;;  %v286_v15 = vld [vmem:[#allocation8 + $0x168] sm:$0xff]  ;;  %348 = vmatpush.msra.mxu0 %v287_v12  ;;  %v252_v20 = vld [vmem:[#allocation8 + $0x58] sm:$0xff]  ;;  %v267_v21 = vld [vmem:[#allocation8 + $0xd0] sm:$0xff] }
  0x22   :  { %186 = vmatpush.msra.mxu2 %v1140_v3  ;;  %227 = vmatpush.msra.mxu1 %v1140_v3  ;;  %v1154_v18 = vld [vmem:[#allocation5 + $0x8] sm:$0xff]  ;;  %v285_v22 = vld [vmem:[#allocation8 + $0x160] sm:$0xff]  ;;  %v251_v23 = vld [vmem:[#allocation8 + $0x50] sm:$0xff] }
  0x23   :  { %815 = vmatmul.msk.f32.vlgmr.msra.gmra.mxu2 %vm158_vm0, %v1143_v5  ;;  %819 = vmatmul.msk.f32.vlgmr.msra.gmra.mxu1 %vm158_vm0, %v1146_v6  ;;  %v1156_v19 = vld [vmem:[#allocation7 + $0x8] sm:$0xff]  ;;  %v265_v26 = vld [vmem:[#allocation8 + $0xc0] sm:$0xff]  ;;  %v284_v27 = vld [vmem:[#allocation8 + $0x158] sm:$0xff] }
  0x24   :  { %289 = vmatpush.msrb.mxu2 %v256_v7  ;;  %321 = vmatpush.msra.mxu3 %v269_v14  ;;  %v250_v24 = vld [vmem:[#allocation8 + $0x48] sm:$0xff]  ;;  %v283_v28 = vld [vmem:[#allocation8 + $0x150] sm:$0xff]  ;;  %v249_v29 = vld [vmem:[#allocation8 + $0x40] sm:$0xff] }
  0x25   :  { %349 = vmatpush.msra.mxu0 %v286_v15  ;;  %v266_v25 = vld [vmem:[#allocation8 + $0xc8] sm:$0xff]  ;;  %v264_v30 = vld [vmem:[#allocation8 + $0xb8] sm:$0xff]  ;;  %v1162_v31 = vld [vmem:[#allocation5 + $0x10] sm:$0xff] }
  0x26   :  { %290 = vmatpush.msrb.mxu2 %v255_v10  ;;  %322 = vmatpush.msra.mxu3 %v268_v17  ;;  %v1164_v32 = vld [vmem:[#allocation7 + $0x10] sm:$0xff]  ;;  %v248_v33 = vld [vmem:[#allocation8 + $0x38] sm:$0xff]  ;;  %v282_v35 = vld [vmem:[#allocation8 + $0x148] sm:$0xff] }
  0x27   :  { %350 = vmatpush.msra.mxu0 %v285_v22  ;;  %v263_v34 = vld [vmem:[#allocation8 + $0xb0] sm:$0xff]  ;;  %v262_v37 = vld [vmem:[#allocation8 + $0xa8] sm:$0xff]  ;;  %v281_v38 = vld [vmem:[#allocation8 + $0x140] sm:$0xff] }
  0x28   :  { %291 = vmatpush.msrb.mxu2 %v254_v13  ;;  %323 = vmatpush.msra.mxu3 %v267_v21  ;;  %v247_v36 = vld [vmem:[#allocation8 + $0x30] sm:$0xff]  ;;  %v246_v39 = vld [vmem:[#allocation8 + $0x28] sm:$0xff]  ;;  %v261_v40 = vld [vmem:[#allocation8 + $0xa0] sm:$0xff] }
  0x29   :  { %351 = vmatpush.msra.mxu0 %v284_v27  ;;  %v280_v41 = vld [vmem:[#allocation8 + $0x138] sm:$0xff]  ;;  %v245_v42 = vld [vmem:[#allocation8 + $0x20] sm:$0xff]  ;;  %v259_v47 = vld [vmem:[#allocation8 + $0x90] sm:$0xff] }
  0x2a   :  { %292 = vmatpush.msrb.mxu2 %v253_v16  ;;  %324 = vmatpush.msra.mxu3 %v266_v25  ;;  %v260_v43 = vld [vmem:[#allocation8 + $0x98] sm:$0xff]  ;;  %v279_v48 = vld [vmem:[#allocation8 + $0x130] sm:$0xff]  ;;  %v258_v50 = vld [vmem:[#allocation8 + $0x88] sm:$0xff] }
  0x2b   :  { %816 = vmatmul.msk.f32.gmra.mxu2 %vm158_vm0, %v1154_v18  ;;  %820 = vmatmul.msk.f32.gmra.mxu1 %vm158_vm0, %v1156_v19  ;;  %v1170_v44 = vld [vmem:[#allocation5 + $0x18] sm:$0xff]  ;;  %v243_v49 = vld [vmem:[#allocation8 + $0x10] sm:$0xff]  ;;  %v278_v51 = vld [vmem:[#allocation8 + $0x128] sm:$0xff] }
  0x2c   :  { %293 = vmatpush.msrb.mxu2 %v252_v20  ;;  %325 = vmatpush.msra.mxu3 %v265_v26  ;;  %v1172_v45 = vld [vmem:[#allocation7 + $0x18] sm:$0xff]  ;;  %v242_v52 = vld [vmem:[#allocation8 + $0x8] sm:$0xff]  ;;  %v241_v53 = vld [vmem:[#allocation8] sm:$0xff] }
  0x2d   :  { %352 = vmatpush.msra.mxu0 %v283_v28  ;;  %v244_v46 = vld [vmem:[#allocation8 + $0x18] sm:$0xff]  ;;  %v257_v54 = vld [vmem:[#allocation8 + $0x80] sm:$0xff]  ;;  %v275_v57 = vld [vmem:[#allocation8 + $0x110] sm:$0xff] }
  0x2e   :  { %294 = vmatpush.msrb.mxu2 %v251_v23  ;;  %326 = vmatpush.msra.mxu3 %v264_v30  ;;  %v277_v55 = vld [vmem:[#allocation8 + $0x120] sm:$0xff]  ;;  %v276_v56 = vld [vmem:[#allocation8 + $0x118] sm:$0xff]  ;;  %v274_v58 = vld [vmem:[#allocation8 + $0x108] sm:$0xff] }
  0x2f   :  { %353 = vmatpush.msra.mxu0 %v282_v35  ;;  %v273_v59 = vld [vmem:[#allocation8 + $0x100] sm:$0xff]  ;;  %v1198_v10 = vld [vmem:[#allocation11 + $0x58] sm:$0xff]  ;;  %v1202_v11 = vld [vmem:[#allocation11 + $0x50] sm:$0xff] }
  0x30   :  { %295 = vmatpush.msrb.mxu2 %v250_v24  ;;  %327 = vmatpush.msra.mxu3 %v263_v34  ;;  %v1194_v9 = vld [vmem:[#allocation11 + $0x60] sm:$0xff]  ;;  %v1206_v12 = vld [vmem:[#allocation11 + $0x48] sm:$0xff]  ;;  %v1214_v16 = vld [vmem:[#allocation11 + $0x38] sm:$0xff] }
  0x31   :  { %354 = vmatpush.msra.mxu0 %v281_v38  ;;  %v1210_v14 = vld [vmem:[#allocation11 + $0x40] sm:$0xff]  ;;  %v1218_v17 = vld [vmem:[#allocation11 + $0x30] sm:$0xff]  ;;  %v1222_v20 = vld [vmem:[#allocation11 + $0x28] sm:$0xff] }
  0x32   :  { %296 = vmatpush.msrb.mxu2 %v249_v29  ;;  %328 = vmatpush.msra.mxu3 %v262_v37  ;;  %v1226_v22 = vld [vmem:[#allocation11 + $0x20] sm:$0xff]  ;;  %v1228_v23 = vld [vmem:[#allocation11 + $0x18] sm:$0xff]  ;;  %v1232_v25 = vld [vmem:[#allocation11 + $0x10] sm:$0xff] }
  0x33   :  { %817 = vmatmul.msk.f32.gmra.mxu2 %vm158_vm0, %v1162_v31  ;;  %821 = vmatmul.msk.f32.gmra.mxu1 %vm158_vm0, %v1164_v32  ;;  %v1236_v27 = vld [vmem:[#allocation11 + $0x8] sm:$0xff]  ;;  %v1240_v28 = vld [vmem:[#allocation11] sm:$0xff] }
  0x34   :  { %297 = vmatpush.msrb.mxu2 %v248_v33  ;;  %329 = vmatpush.msra.mxu3 %v261_v40 }
  0x35   :  { %355 = vmatpush.msra.mxu0 %v280_v41 }
  0x36   :  { %298 = vmatpush.msrb.mxu2 %v247_v36  ;;  %330 = vmatpush.msra.mxu3 %v260_v43 }
  0x37   :  { %356 = vmatpush.msra.mxu0 %v279_v48 }
  0x38   :  { %299 = vmatpush.msrb.mxu2 %v246_v39  ;;  %331 = vmatpush.msra.mxu3 %v259_v47 }
  0x39   :  { %357 = vmatpush.msra.mxu0 %v278_v51 }
  0x3a   :  { %300 = vmatpush.msrb.mxu2 %v245_v42  ;;  %332 = vmatpush.msra.mxu3 %v258_v50 }
  0x3b   :  { %818 = vmatmul.msk.f32.gmra.mxu2 %vm158_vm0, %v1170_v44  ;;  %822 = vmatmul.msk.f32.gmra.mxu1 %vm158_vm0, %v1172_v45 }
  0x3c   :  { %301 = vmatpush.msrb.mxu2 %v244_v46  ;;  %333 = vmatpush.msra.mxu3 %v257_v54 }
  0x3d   :  { %358 = vmatpush.msra.mxu0 %v277_v55  ;;  %334 = vmatmul.f32.vlgmr.msra.gmra.mxu3 %v1140_v3 }
  0x3e   :  { %302 = vmatpush.msrb.mxu2 %v243_v49 }
  0x3f   :  { %359 = vmatpush.msra.mxu0 %v276_v56 }
  0x40   :  { %303 = vmatpush.msrb.mxu2 %v242_v52 }
  0x41   :  { %360 = vmatpush.msra.mxu0 %v275_v57 }
  0x42   :  { %304 = vmatpush.msrb.mxu2 %v241_v53 }
  0x43   :  { %361 = vmatpush.msra.mxu0 %v274_v58 }
  0x45   :  { %362 = vmatpush.msra.mxu0 %v273_v59  ;;  %337 = vmatmul.f32.gmra.mxu3 %v1136_v2  ;;  %v1182_v2 = vld [vmem:[#allocation11 + $0x78] sm:$0xff] }
  0x46   :  { %400 = vmatpush.msrb.mxu1 %v1182_v2  ;;  %421 = vmatpush.msrb.mxu3 %v1182_v2 }
  0x4d   :  { %340 = vmatmul.f32.gmra.mxu3 %v1132_v1  ;;  %v1190_v1 = vld [vmem:[#allocation11 + $0x68] sm:$0xff] }
  0x55   :  { %343 = vmatmul.f32.gmra.mxu3 %v1130_v0  ;;  %v1186_v0 = vld [vmem:[#allocation11 + $0x70] sm:$0xff] }
  0x56   :  { %401 = vmatpush.msrb.mxu1 %v1186_v0  ;;  %422 = vmatpush.msrb.mxu3 %v1186_v0 }
  0x58   :  { %402 = vmatpush.msrb.mxu1 %v1190_v1  ;;  %423 = vmatpush.msrb.mxu3 %v1190_v1 }
  0x5a   :  { %403 = vmatpush.msrb.mxu1 %v1194_v9  ;;  %424 = vmatpush.msrb.mxu3 %v1194_v9 }
  0x5c   :  { %404 = vmatpush.msrb.mxu1 %v1198_v10  ;;  %425 = vmatpush.msrb.mxu3 %v1198_v10 }
  0x5e   :  { %405 = vmatpush.msrb.mxu1 %v1202_v11  ;;  %426 = vmatpush.msrb.mxu3 %v1202_v11 }
  0x60   :  { %406 = vmatpush.msrb.mxu1 %v1206_v12  ;;  %427 = vmatpush.msrb.mxu3 %v1206_v12 }
  0x62   :  { %407 = vmatpush.msrb.mxu1 %v1210_v14  ;;  %428 = vmatpush.msrb.mxu3 %v1210_v14 }
  0x64   :  { %408 = vmatpush.msrb.mxu1 %v1214_v16  ;;  %429 = vmatpush.msrb.mxu3 %v1214_v16 }
  0x66   :  { %409 = vmatpush.msrb.mxu1 %v1218_v17  ;;  %430 = vmatpush.msrb.mxu3 %v1218_v17 }
  0x68   :  { %410 = vmatpush.msrb.mxu1 %v1222_v20  ;;  %431 = vmatpush.msrb.mxu3 %v1222_v20 }
  0x6a   :  { %411 = vmatpush.msrb.mxu1 %v1226_v22  ;;  %432 = vmatpush.msrb.mxu3 %v1226_v22 }
  0x6c   :  { %412 = vmatpush.msrb.mxu1 %v1228_v23  ;;  %433 = vmatpush.msrb.mxu3 %v1228_v23 }
  0x6e   :  { %413 = vmatpush.msrb.mxu1 %v1232_v25  ;;  %434 = vmatpush.msrb.mxu3 %v1232_v25 }
  0x70   :  { %414 = vmatpush.msrb.mxu1 %v1236_v27  ;;  %435 = vmatpush.msrb.mxu3 %v1236_v27 }
  0x72   :  { %415 = vmatpush.msrb.mxu1 %v1240_v28  ;;  %436 = vmatpush.msrb.mxu3 %v1240_v28 }
  0xa0   :  { %v229_v60 = vpop.f32.mrf.mxu1 }
  0xa1   :  { %363 = vmatmul.f32.vlgmr.msra.gmra.mxu0 %v229_v60 }
  0xa6   :  { %v188_v61 = vpop.f32.mrf.mxu2 }
  0xa7   :  { %305 = vmatmul.f32.vlgmr.msrb.gmra.mxu2 %v188_v61 }
  0xa8   :  { %v232_v62 = vpop.f32.mrf.mxu1 }
  0xa9   :  { %366 = vmatmul.f32.gmra.mxu0 %v232_v62 }
  0xae   :  { %v191_v63 = vpop.f32.mrf.mxu2 }
  0xaf   :  { %308 = vmatmul.f32.gmra.mxu2 %v191_v63 }
  0xb0   :  { %v235_v3 = vpop.f32.mrf.mxu1 }
  0xb1   :  { %369 = vmatmul.f32.gmra.mxu0 %v235_v3 }
  0xb6   :  { %v194_v4 = vpop.f32.mrf.mxu2 }
  0xb7   :  { %311 = vmatmul.f32.gmra.mxu2 %v194_v4 }
  0xb8   :  { %v238_v7 = vpop.f32.mrf.mxu1 }
  0xb9   :  { %372 = vmatmul.f32.gmra.mxu0 %v238_v7 }
  0xbe   :  { %v197_v8 = vpop.f32.mrf.mxu2 }
  0xbf   :  { %314 = vmatmul.f32.gmra.mxu2 %v197_v8 }
  0xc0   :  { %v335_v13 = vpop.f32.mrf.mxu3 }
  0xc8   :  { %v338_v24 = vpop.f32.mrf.mxu3 }
  0xd0   :  { %v341_v30 = vpop.f32.mrf.mxu3 }
  0xd8   :  { %v344_v41 = vpop.f32.mrf.mxu3 }
 0x11e   :  { %v364_v15 = vpop.f32.mrf.mxu0 }
 0x126   :  { %v367_v26 = vpop.f32.mrf.mxu0 }
 0x12a   :  { %v306_v21 = vpop.f32.mrf.mxu2 }
 0x12b   :  { %v336_v36 = vadd.f32 %v335_v13, %v306_v21 }
 0x12d   :  { %v365_v39 = vadd.f32 %v364_v15, %v336_v36 }
 0x12e   :  { %v370_v33 = vpop.f32.mrf.mxu0 }
 0x12f   :  { %v387_v47 = vmul.f32 %v365_v39, %v365_v39 }
 0x132   :  { %v309_v29 = vpop.f32.mrf.mxu2 }
 0x133   :  { %v339_v34 = vadd.f32 %v338_v24, %v309_v29 }
 0x135   :  { %v368_v38 = vadd.f32 %v367_v26, %v339_v34 }
 0x136   :  { %v373_v46 = vpop.f32.mrf.mxu0 }
 0x137   :  { %v388_v42 = vmul.f32 %v368_v38, %v368_v38  ;;  %v378_v48 = vadd.f32 %v368_v38, %v365_v39 }
 0x139   :  { %v391_v51 = vadd.f32 %v388_v42, %v387_v47 }
 0x13a   :  { %v312_v35 = vpop.f32.mrf.mxu2 }
 0x13b   :  { %v342_v37 = vadd.f32 %v341_v30, %v312_v35 }
 0x13d   :  { %v371_v40 = vadd.f32 %v370_v33, %v342_v37 }
 0x13f   :  { %v389_v49 = vmul.f32 %v371_v40, %v371_v40  ;;  %v379_v52 = vadd.f32 %v378_v48, %v371_v40 }
 0x141   :  { %v392_v54 = vadd.f32 %v391_v51, %v389_v49  ;;  %v840_v51 = vld [vmem:[%s1336_s4] ss:$0 sm:$0xff] }
 0x142   :  { %v315_v43 = vpop.f32.mrf.mxu2 }
 0x143   :  { %v345_v50 = vadd.f32 %v344_v41, %v315_v43 }
 0x145   :  { %v374_v53 = vadd.f32 %v373_v46, %v345_v50 }
 0x147   :  { %v380_v55 = vadd.f32 %v379_v52, %v374_v53  ;;  %v390_v56 = vmul.f32 %v374_v53, %v374_v53 }
 0x149   :  { %v381_v57 = vrot.slane %v380_v55, 4  ;;  %v393_v58 = vadd.f32 %v392_v54, %v390_v56 }
 0x14b   :  { %v382_v59 = vadd.f32 %v381_v57, %v380_v55  ;;  %v394_v60 = vrot.slane %v393_v58, 4  ;;  %v841_v57 = vld [vmem:[%s1337_s5] ss:$0 sm:$0xff] }
 0x14d   :  { %v383_v61 = vrot.slane %v382_v59, 2  ;;  %v395_v62 = vadd.f32 %v394_v60, %v393_v58 }
 0x14f   :  { %v384_v63 = vadd.f32 %v383_v61, %v382_v59  ;;  %v396_v3 = vrot.slane %v395_v62, 2 }
 0x151   :  { %v385_v4 = vrot.slane %v384_v63, 1  ;;  %v397_v7 = vadd.f32 %v396_v3, %v395_v62 }
 0x153   :  { %v386_v8 = vadd.f32 %v385_v4, %v384_v63  ;;  %v398_v13 = vrot.slane %v397_v7, 1 }
 0x155   :  { %416 = vmatmul.f32.vlgmr.msrb.gmra.mxu1 %v386_v8  ;;  %v399_v15 = vadd.f32 %v398_v13, %v397_v7 }
 0x157   :  { %437 = vmatmul.f32.vlgmr.msrb.gmra.mxu3 %v399_v15  ;;  %v573_v15 = vld [vmem:[#allocation10 + $0xf8] sm:$0xff] }
 0x1d2   :  { %v417_v21 = vpop.f32.mrf.mxu1 }
 0x1d3   :  { %v420_v24 = vmul.f32 0.001953125, %v417_v21  ;;  %v572_v21 = vld [vmem:[#allocation10 + $0xf0] sm:$0xff] }
 0x1d5   :  { %v442_v29 = vmul.f32 %v420_v24, %v420_v24  ;;  %v445_v43 = vperm.slane %v420_v24, 0  ;;  %v571_v24 = vld [vmem:[#allocation10 + $0xe8] sm:$0xff] }
 0x1d7   :  { %v449_v48 = vsub.f32 %v374_v53, %v445_v43  ;;  %v448_v52 = vsub.f32 %v371_v40, %v445_v43  ;;  %v447_v54 = vsub.f32 %v368_v38, %v445_v43  ;;  %v446_v55 = vsub.f32 %v365_v39, %v445_v43  ;;  %v588_v43 = vld [vmem:[#allocation10 + $0x170] sm:$0xff] }
 0x1da   :  { %v438_v26 = vpop.f32.mrf.mxu3 }
 0x1db   :  { %v441_v30 = vmul.f32 0.001953125, %v438_v26  ;;  %v570_v26 = vld [vmem:[#allocation10 + $0xe0] sm:$0xff] }
 0x1dd   :  { %v443_v33 = vsub.f32 %v441_v30, %v442_v29  ;;  %v569_v29 = vld [vmem:[#allocation10 + $0xd8] sm:$0xff]  ;;  %v566_v30 = vld [vmem:[#allocation10 + $0xc0] sm:$0xff] }
 0x1df   :  { %v444_v34 = vmax.f32 %v443_v33, 0.0  ;;  %v565_v33 = vld [vmem:[#allocation10 + $0xb8] sm:$0xff] }
 0x1e1   :  { %v450_v35 = vadd.f32 1e-05, %v444_v34  ;;  %v562_v34 = vld [vmem:[#allocation10 + $0xa0] sm:$0xff] }
 0x1e3   :  { %844 = vrsqrt.f32 %v450_v35  ;;  %vm457_vm2 = vweird.f32 %v450_v35 }
 0x1e9   :  { %v845_v36 = vpop.eup %844 }
 0x1ea   :  { %v452_v37 = vmul.f32 %v845_v36, %v450_v35  ;;  %vm458_vm1 = vweird.f32 %v845_v36  ;;  %v561_v35 = vld [vmem:[#allocation10 + $0x98] sm:$0xff] }
 0x1eb   :  { %vm459_vm3 = vmor %vm457_vm2, %vm458_vm1 }
 0x1ec   :  { %v453_v41 = vmul.f32 %v845_v36, %v452_v37  ;;  %v589_v37 = vld [vmem:[#allocation10 + $0x178] sm:$0xff] }
 0x1ed   :  { %648 = vmatpush.msra.mxu2 %v589_v37 }
 0x1ee   :  { %v454_v42 = vmul.f32 0.5, %v453_v41  ;;  %v559_v41 = vld [vmem:[#allocation10 + $0x88] sm:$0xff] }
 0x1ef   :  { %649 = vmatpush.msra.mxu2 %v588_v43 }
 0x1f0   :  { %v455_v46 = vsub.f32 1.5, %v454_v42  ;;  %v555_v42 = vld [vmem:[#allocation10 + $0x68] sm:$0xff] }
 0x1f2   :  { %v456_v47 = vmul.f32 %v845_v36, %v455_v46  ;;  %v587_v46 = vld [vmem:[#allocation10 + $0x168] sm:$0xff] }
 0x1f3   :  { %650 = vmatpush.msra.mxu2 %v587_v46 }
 0x1f4   :  { %v460_v49 = vsel %vm459_vm3, %v845_v36, %v456_v47  ;;  %v556_v36 = vld [vmem:[#allocation10 + $0x70] sm:$0xff]  ;;  %v558_v47 = vld [vmem:[#allocation10 + $0x80] sm:$0xff] }
 0x1f5   :  { %v461_v50 = vperm.slane %v460_v49, 0  ;;  %v585_v49 = vld [vmem:[#allocation10 + $0x158] sm:$0xff] }
 0x1f7   :  { %v465_v56 = vmul.f32 %v461_v50, %v449_v48  ;;  %v464_v58 = vmul.f32 %v461_v50, %v448_v52  ;;  %v463_v59 = vmul.f32 %v461_v50, %v447_v54  ;;  %v462_v60 = vmul.f32 %v461_v50, %v446_v55  ;;  %v553_v48 = vld [vmem:[#allocation10 + $0x58] sm:$0xff]  ;;  %v552_v50 = vld [vmem:[#allocation10 + $0x50] sm:$0xff]  ;;  %v551_v52 = vld [vmem:[#allocation10 + $0x48] sm:$0xff] }
 0x1f8   :  { %v583_v54 = vld [vmem:[#allocation10 + $0x148] sm:$0xff]  ;;  %v550_v55 = vld [vmem:[#allocation10 + $0x40] sm:$0xff] }
 0x1f9   :  { %v472_v61 = vmul.f32 %v840_v51, %v465_v56  ;;  %v471_v62 = vmul.f32 %v840_v51, %v464_v58  ;;  %v470_v53 = vmul.f32 %v840_v51, %v463_v59  ;;  %v469_v4 = vmul.f32 %v840_v51, %v462_v60  ;;  %v584_v51 = vld [vmem:[#allocation10 + $0x150] sm:$0xff]  ;;  %v582_v56 = vld [vmem:[#allocation10 + $0x140] sm:$0xff]  ;;  %v581_v58 = vld [vmem:[#allocation10 + $0x138] sm:$0xff] }
 0x1fa   :  { %v548_v59 = vld [vmem:[#allocation10 + $0x30] sm:$0xff] }
 0x1fb   :  { %v479_v63 = vadd.f32 %v841_v57, %v472_v61  ;;  %v478_v3 = vadd.f32 %v841_v57, %v471_v62  ;;  %v477_v8 = vadd.f32 %v841_v57, %v470_v53  ;;  %v476_v39 = vadd.f32 %v841_v57, %v469_v4  ;;  %v549_v57 = vld [vmem:[#allocation10 + $0x38] sm:$0xff]  ;;  %v580_v60 = vld [vmem:[#allocation10 + $0x130] sm:$0xff]  ;;  %v547_v61 = vld [vmem:[#allocation10 + $0x28] sm:$0xff] }
 0x1fc   :  { %v579_v62 = vld [vmem:[#allocation10 + $0x128] sm:$0xff]  ;;  %v546_v53 = vld [vmem:[#allocation10 + $0x20] sm:$0xff]  ;;  %v544_v4 = vld [vmem:[#allocation10 + $0x10] sm:$0xff] }
 0x1fd   :  { %v1252_v7 = vmax.f32 %v479_v63, 0.0  ;;  %v1256_v38 = vmax.f32 %v478_v3, 0.0  ;;  %v1260_v40 = vmax.f32 %v477_v8, 0.0  ;;  %v1264_v13 = vmax.f32 %v476_v39, 0.0  ;;  %v578_v63 = vld [vmem:[#allocation10 + $0x120] sm:$0xff]  ;;  %v545_v3 = vld [vmem:[#allocation10 + $0x18] sm:$0xff] }
 0x1fe   :  { %v543_v8 = vld [vmem:[#allocation10 + $0x8] sm:$0xff]  ;;  %v542_v39 = vld [vmem:[#allocation10] sm:$0xff] }
 0x1ff   :  { %496 = vmatpush.msra.mxu1 %v1252_v7  ;;  %525 = vmatpush.msra.mxu3 %v1252_v7 }
 0x201   :  { %497 = vmatpush.msra.mxu1 %v1256_v38  ;;  %526 = vmatpush.msra.mxu3 %v1256_v38 }
 0x203   :  { %498 = vmatpush.msra.mxu1 %v1260_v40  ;;  %527 = vmatpush.msra.mxu3 %v1260_v40 }
 0x205   :  { %499 = vmatpush.msra.mxu1 %v1264_v13  ;;  %528 = vmatpush.msra.mxu3 %v1264_v13 }
 0x206   :  { %823 = vmatmul.msk.f32.vlgmr.msra.gmra.mxu1 %vm158_vm0, %v1143_v5  ;;  %827 = vmatmul.msk.f32.vlgmr.msra.gmra.mxu3 %vm158_vm0, %v1146_v6  ;;  %v568_v5 = vld [vmem:[#allocation10 + $0xd0] sm:$0xff]  ;;  %v567_v6 = vld [vmem:[#allocation10 + $0xc8] sm:$0xff] }
 0x207   :  { %619 = vmatpush.msrb.mxu1 %v573_v15  ;;  %701 = vmatpush.msrb.mxu3 %v1182_v2  ;;  %v575_v15 = vld [vmem:[#allocation10 + $0x108] sm:$0xff] }
 0x209   :  { %620 = vmatpush.msrb.mxu1 %v572_v21  ;;  %702 = vmatpush.msrb.mxu3 %v1186_v0 }
 0x20b   :  { %621 = vmatpush.msrb.mxu1 %v571_v24  ;;  %703 = vmatpush.msrb.mxu3 %v1190_v1 }
 0x20d   :  { %622 = vmatpush.msrb.mxu1 %v570_v26  ;;  %704 = vmatpush.msrb.mxu3 %v1194_v9 }
 0x20e   :  { %824 = vmatmul.msk.f32.gmra.mxu1 %vm158_vm0, %v1154_v18  ;;  %828 = vmatmul.msk.f32.gmra.mxu3 %vm158_vm0, %v1156_v19  ;;  %v564_v18 = vld [vmem:[#allocation10 + $0xb0] sm:$0xff]  ;;  %v563_v19 = vld [vmem:[#allocation10 + $0xa8] sm:$0xff] }
 0x20f   :  { %623 = vmatpush.msrb.mxu1 %v569_v29  ;;  %705 = vmatpush.msrb.mxu3 %v1198_v10 }
 0x211   :  { %624 = vmatpush.msrb.mxu1 %v568_v5  ;;  %706 = vmatpush.msrb.mxu3 %v1202_v11 }
 0x213   :  { %625 = vmatpush.msrb.mxu1 %v567_v6  ;;  %707 = vmatpush.msrb.mxu3 %v1206_v12 }
 0x215   :  { %626 = vmatpush.msrb.mxu1 %v566_v30  ;;  %708 = vmatpush.msrb.mxu3 %v1210_v14 }
 0x216   :  { %825 = vmatmul.msk.f32.gmra.mxu1 %vm158_vm0, %v1162_v31  ;;  %829 = vmatmul.msk.f32.gmra.mxu3 %vm158_vm0, %v1164_v32  ;;  %v560_v31 = vld [vmem:[#allocation10 + $0x90] sm:$0xff]  ;;  %v557_v32 = vld [vmem:[#allocation10 + $0x78] sm:$0xff] }
 0x217   :  { %627 = vmatpush.msrb.mxu1 %v565_v33  ;;  %709 = vmatpush.msrb.mxu3 %v1214_v16 }
 0x218   :  { %590 = vmatpush.msrb.mxu0 %v557_v32 }
 0x219   :  { %628 = vmatpush.msrb.mxu1 %v564_v18  ;;  %710 = vmatpush.msrb.mxu3 %v1218_v17 }
 0x21a   :  { %591 = vmatpush.msrb.mxu0 %v556_v36 }
 0x21b   :  { %629 = vmatpush.msrb.mxu1 %v563_v19  ;;  %711 = vmatpush.msrb.mxu3 %v1222_v20 }
 0x21c   :  { %592 = vmatpush.msrb.mxu0 %v555_v42 }
 0x21d   :  { %630 = vmatpush.msrb.mxu1 %v562_v34  ;;  %712 = vmatpush.msrb.mxu3 %v1226_v22 }
 0x21e   :  { %826 = vmatmul.msk.f32.gmra.mxu1 %vm158_vm0, %v1170_v44  ;;  %830 = vmatmul.msk.f32.gmra.mxu3 %vm158_vm0, %v1172_v45  ;;  %v554_v44 = vld [vmem:[#allocation10 + $0x60] sm:$0xff] }
 0x21f   :  { %631 = vmatpush.msrb.mxu1 %v561_v35  ;;  %713 = vmatpush.msrb.mxu3 %v1228_v23  ;;  %v586_v45 = vld [vmem:[#allocation10 + $0x160] sm:$0xff] }
 0x220   :  { %593 = vmatpush.msrb.mxu0 %v554_v44  ;;  %651 = vmatpush.msra.mxu2 %v586_v45 }
 0x221   :  { %632 = vmatpush.msrb.mxu1 %v560_v31  ;;  %714 = vmatpush.msrb.mxu3 %v1232_v25 }
 0x222   :  { %594 = vmatpush.msrb.mxu0 %v553_v48  ;;  %652 = vmatpush.msra.mxu2 %v585_v49 }
 0x223   :  { %633 = vmatpush.msrb.mxu1 %v559_v41  ;;  %715 = vmatpush.msrb.mxu3 %v1236_v27 }
 0x224   :  { %595 = vmatpush.msrb.mxu0 %v552_v50  ;;  %653 = vmatpush.msra.mxu2 %v584_v51 }
 0x225   :  { %634 = vmatpush.msrb.mxu1 %v558_v47  ;;  %716 = vmatpush.msrb.mxu3 %v1240_v28 }
 0x226   :  { %635 = vmatmul.f32.vlgmr.msrb.gmra.mxu1 %v1264_v13  ;;  %596 = vmatpush.msrb.mxu0 %v551_v52  ;;  %v576_v13 = vld [vmem:[#allocation10 + $0x110] sm:$0xff] }
 0x227   :  { %654 = vmatpush.msra.mxu2 %v583_v54 }
 0x228   :  { %597 = vmatpush.msrb.mxu0 %v550_v55 }
 0x229   :  { %655 = vmatpush.msra.mxu2 %v582_v56 }
 0x22a   :  { %598 = vmatpush.msrb.mxu0 %v549_v57 }
 0x22b   :  { %656 = vmatpush.msra.mxu2 %v581_v58 }
 0x22c   :  { %599 = vmatpush.msrb.mxu0 %v548_v59 }
 0x22d   :  { %657 = vmatpush.msra.mxu2 %v580_v60 }
 0x22e   :  { %638 = vmatmul.f32.gmra.mxu1 %v1260_v40  ;;  %600 = vmatpush.msrb.mxu0 %v547_v61  ;;  %v577_v40 = vld [vmem:[#allocation10 + $0x118] sm:$0xff] }
 0x22f   :  { %658 = vmatpush.msra.mxu2 %v579_v62 }
 0x230   :  { %601 = vmatpush.msrb.mxu0 %v546_v53 }
 0x231   :  { %659 = vmatpush.msra.mxu2 %v578_v63 }
 0x232   :  { %602 = vmatpush.msrb.mxu0 %v545_v3 }
 0x233   :  { %660 = vmatpush.msra.mxu2 %v577_v40 }
 0x234   :  { %603 = vmatpush.msrb.mxu0 %v544_v4 }
 0x235   :  { %661 = vmatpush.msra.mxu2 %v576_v13 }
 0x236   :  { %641 = vmatmul.f32.gmra.mxu1 %v1256_v38  ;;  %604 = vmatpush.msrb.mxu0 %v543_v8  ;;  %v574_v38 = vld [vmem:[#allocation10 + $0x100] sm:$0xff] }
 0x237   :  { %662 = vmatpush.msra.mxu2 %v575_v15 }
 0x238   :  { %605 = vmatpush.msrb.mxu0 %v542_v39 }
 0x239   :  { %663 = vmatpush.msra.mxu2 %v574_v38 }
 0x23a   :  { %722 = vmatpush.msra.mxu0 %v1182_v2 }
 0x23c   :  { %723 = vmatpush.msra.mxu0 %v1186_v0 }
 0x23e   :  { %644 = vmatmul.f32.gmra.mxu1 %v1252_v7  ;;  %724 = vmatpush.msra.mxu0 %v1190_v1 }
 0x240   :  { %725 = vmatpush.msra.mxu0 %v1194_v9 }
 0x242   :  { %726 = vmatpush.msra.mxu0 %v1198_v10 }
 0x244   :  { %727 = vmatpush.msra.mxu0 %v1202_v11 }
 0x246   :  { %728 = vmatpush.msra.mxu0 %v1206_v12 }
 0x248   :  { %729 = vmatpush.msra.mxu0 %v1210_v14 }
 0x24a   :  { %730 = vmatpush.msra.mxu0 %v1214_v16 }
 0x24c   :  { %731 = vmatpush.msra.mxu0 %v1218_v17 }
 0x24e   :  { %732 = vmatpush.msra.mxu0 %v1222_v20 }
 0x250   :  { %733 = vmatpush.msra.mxu0 %v1226_v22 }
 0x252   :  { %734 = vmatpush.msra.mxu0 %v1228_v23 }
 0x254   :  { %735 = vmatpush.msra.mxu0 %v1232_v25 }
 0x256   :  { %736 = vmatpush.msra.mxu0 %v1236_v27 }
 0x258   :  { %737 = vmatpush.msra.mxu0 %v1240_v28 }
 0x283   :  { %v501_v2 = vpop.f32.mrf.mxu1 }
 0x284   :  { %606 = vmatmul.f32.vlgmr.msrb.gmra.mxu0 %v501_v2 }
 0x289   :  { %v530_v0 = vpop.f32.mrf.mxu3 }
 0x28a   :  { %664 = vmatmul.f32.vlgmr.msra.gmra.mxu2 %v530_v0 }
 0x28b   :  { %v504_v1 = vpop.f32.mrf.mxu1 }
 0x28c   :  { %609 = vmatmul.f32.gmra.mxu0 %v504_v1 }
 0x291   :  { %v533_v9 = vpop.f32.mrf.mxu3 }
 0x292   :  { %667 = vmatmul.f32.gmra.mxu2 %v533_v9 }
 0x293   :  { %v507_v10 = vpop.f32.mrf.mxu1 }
 0x294   :  { %612 = vmatmul.f32.gmra.mxu0 %v507_v10 }
 0x299   :  { %v536_v11 = vpop.f32.mrf.mxu3 }
 0x29a   :  { %670 = vmatmul.f32.gmra.mxu2 %v536_v11 }
 0x29b   :  { %v510_v12 = vpop.f32.mrf.mxu1 }
 0x29c   :  { %615 = vmatmul.f32.gmra.mxu0 %v510_v12 }
 0x2a1   :  { %v539_v14 = vpop.f32.mrf.mxu3 }
 0x2a2   :  { %673 = vmatmul.f32.gmra.mxu2 %v539_v14  ;;  %v842_v14 = vld [vmem:[%s1339_s7] ss:$0 sm:$0xff]  ;;  %s1038_s7 = smov [#allocation13]  }
 0x2a3   :  { %v636_v17 = vpop.f32.mrf.mxu1 }
 0x2ab   :  { %v639_v23 = vpop.f32.mrf.mxu1 }
 0x2b3   :  { %v642_v28 = vpop.f32.mrf.mxu1 }
 0x2bb   :  { %v645_v18 = vpop.f32.mrf.mxu1 }
 0x301   :  { %v607_v16 = vpop.f32.mrf.mxu0 }
 0x302   :  { %v637_v24 = vadd.f32 %v636_v17, %v607_v16 }
 0x309   :  { %v610_v20 = vpop.f32.mrf.mxu0 }
 0x30a   :  { %v640_v7 = vadd.f32 %v639_v23, %v610_v20  ;;  %v843_v23 = vld [vmem:[%s1340_s8] ss:$0 sm:$0xff]  ;;  %s797_s8 = sshll.u32 %s1038_s7, 4  ;;  %s798_s8 = int_to_ptr.vmem [resolvable:$true] %s797_s8 }
 0x30d   :  { %v665_v22 = vpop.f32.mrf.mxu2 }
 0x30e   :  { %v666_v5 = vadd.f32 %v665_v22, %v637_v24 }
 0x310   :  { %v688_v19 = vmul.f32 %v666_v5, %v666_v5 }
 0x311   :  { %v613_v27 = vpop.f32.mrf.mxu0 }
 0x312   :  { %v643_v26 = vadd.f32 %v642_v28, %v613_v27 }
 0x315   :  { %v668_v25 = vpop.f32.mrf.mxu2 }
 0x316   :  { %v669_v29 = vadd.f32 %v668_v25, %v640_v7 }
 0x318   :  { %v689_v33 = vmul.f32 %v669_v29, %v669_v29  ;;  %v679_v34 = vadd.f32 %v669_v29, %v666_v5 }
 0x319   :  { %v616_v30 = vpop.f32.mrf.mxu0 }
 0x31a   :  { %v646_v35 = vadd.f32 %v645_v18, %v616_v30  ;;  %v692_v36 = vadd.f32 %v689_v33, %v688_v19  ;;  %v849_v30 = vld [vmem:[#allocation2 + $0x8] sm:$0xff]  ;;  %v850_v18 = vld [vmem:[#allocation2 + $0x10] sm:$0xff] }
 0x31d   :  { %v671_v21 = vpop.f32.mrf.mxu2 }
 0x31e   :  { %v672_v6 = vadd.f32 %v671_v21, %v643_v26 }
 0x320   :  { %v690_v31 = vmul.f32 %v672_v6, %v672_v6  ;;  %v680_v37 = vadd.f32 %v679_v34, %v672_v6  ;;  %v851_v34 = vld [vmem:[#allocation2 + $0x18] sm:$0xff] }
 0x322   :  { %v693_v42 = vadd.f32 %v692_v36, %v690_v31 }
 0x325   :  { %v674_v32 = vpop.f32.mrf.mxu2 }
 0x326   :  { %v675_v41 = vadd.f32 %v674_v32, %v646_v35 }
 0x328   :  { %v681_v43 = vadd.f32 %v680_v37, %v675_v41  ;;  %v691_v46 = vmul.f32 %v675_v41, %v675_v41 }
 0x32a   :  { %v682_v47 = vrot.slane %v681_v43, 4  ;;  %v694_v44 = vadd.f32 %v693_v42, %v691_v46 }
 0x32c   :  { %v683_v45 = vadd.f32 %v682_v47, %v681_v43  ;;  %v695_v48 = vrot.slane %v694_v44, 4 }
 0x32e   :  { %v684_v49 = vrot.slane %v683_v45, 2  ;;  %v696_v50 = vadd.f32 %v695_v48, %v694_v44 }
 0x330   :  { %v685_v51 = vadd.f32 %v684_v49, %v683_v45  ;;  %v697_v52 = vrot.slane %v696_v50, 2 }
 0x332   :  { %v686_v54 = vrot.slane %v685_v51, 1  ;;  %v698_v55 = vadd.f32 %v697_v52, %v696_v50 }
 0x334   :  { %v687_v56 = vadd.f32 %v686_v54, %v685_v51  ;;  %v699_v57 = vrot.slane %v698_v55, 1 }
 0x336   :  { %717 = vmatmul.f32.vlgmr.msrb.gmra.mxu3 %v687_v56  ;;  %v700_v58 = vadd.f32 %v699_v57, %v698_v55 }
 0x338   :  { %738 = vmatmul.f32.vlgmr.msra.gmra.mxu0 %v700_v58 }
 0x3b5   :  { %v739_v59 = vpop.f32.mrf.mxu0 }
 0x3b6   :  { %v742_v62 = vmul.f32 0.001953125, %v739_v59 }
 0x3b9   :  { %v718_v60 = vpop.f32.mrf.mxu3 }
 0x3ba   :  { %v721_v61 = vmul.f32 0.001953125, %v718_v60 }
 0x3bc   :  { %v743_v53 = vmul.f32 %v721_v61, %v721_v61  ;;  %v746_v15 = vperm.slane %v721_v61, 0 }
 0x3be   :  { %v744_v63 = vsub.f32 %v742_v62, %v743_v53  ;;  %v747_v0 = vsub.f32 %v666_v5, %v746_v15  ;;  %v748_v9 = vsub.f32 %v669_v29, %v746_v15  ;;  %v749_v10 = vsub.f32 %v672_v6, %v746_v15  ;;  %v848_v5 = vld [vmem:[#allocation2] sm:$0xff] }
 0x3bf   :  { %v750_v11 = vsub.f32 %v675_v41, %v746_v15 }
 0x3c0   :  { %v745_v3 = vmax.f32 %v744_v63, 0.0 }
 0x3c2   :  { %v751_v4 = vadd.f32 1e-05, %v745_v3 }
 0x3c4   :  { %846 = vrsqrt.f32 %v751_v4  ;;  %vm758_vm5 = vweird.f32 %v751_v4 }
 0x3ca   :  { %v847_v8 = vpop.eup %846 }
 0x3cb   :  { %v753_v39 = vmul.f32 %v847_v8, %v751_v4  ;;  %vm759_vm4 = vweird.f32 %v847_v8 }
 0x3cc   :  { %vm760_vm6 = vmor %vm758_vm5, %vm759_vm4 }
 0x3cd   :  { %v754_v40 = vmul.f32 %v847_v8, %v753_v39 }
 0x3cf   :  { %v755_v13 = vmul.f32 0.5, %v754_v40 }
 0x3d1   :  { %v756_v38 = vsub.f32 1.5, %v755_v13 }
 0x3d3   :  { %v757_v2 = vmul.f32 %v847_v8, %v756_v38 }
 0x3d5   :  { %v761_v1 = vsel %vm760_vm6, %v847_v8, %v757_v2 }
 0x3d6   :  { %v762_v12 = vperm.slane %v761_v1, 0 }
 0x3d8   :  { %v763_v16 = vmul.f32 %v762_v12, %v747_v0  ;;  %v764_v17 = vmul.f32 %v762_v12, %v748_v9  ;;  %v765_v20 = vmul.f32 %v762_v12, %v749_v10  ;;  %v766_v22 = vmul.f32 %v762_v12, %v750_v11 }
 0x3da   :  { %v770_v25 = vmul.f32 %v842_v14, %v763_v16  ;;  %v771_v27 = vmul.f32 %v842_v14, %v764_v17  ;;  %v772_v28 = vmul.f32 %v842_v14, %v765_v20  ;;  %v773_v7 = vmul.f32 %v842_v14, %v766_v22 }
 0x3dc   :  { %v777_v21 = vadd.f32 %v843_v23, %v770_v25  ;;  %v778_v24 = vadd.f32 %v843_v23, %v771_v27  ;;  %v779_v26 = vadd.f32 %v843_v23, %v772_v28  ;;  %v780_v29 = vadd.f32 %v843_v23, %v773_v7 }
 0x3de   :  { %v781_v6 = vadd.f32 %v848_v5, %v777_v21  ;;  %v782_v33 = vadd.f32 %v849_v30, %v778_v24  ;;  %v783_v19 = vadd.f32 %v850_v18, %v779_v26  ;;  %v784_v35 = vadd.f32 %v851_v34, %v780_v29 }
 0x3e0   :  { %v785_v31 = vmax.f32 %v781_v6, 0.0  ;;  %v786_v32 = vmax.f32 %v782_v33, 0.0  ;;  %v787_v36 = vmax.f32 %v783_v19, 0.0  ;;  %v788_v37 = vmax.f32 %v784_v35, 0.0 }
 0x3e2   :  { %789 = vst [vmem:[#allocation13] sm:$0xff] %v785_v31 }
 0x3e3   :  { %790 = vst [vmem:[#allocation13 + $0x8] sm:$0xff] %v786_v32 }
 0x3e4   :  { %791 = vst [vmem:[#allocation13 + $0x10] sm:$0xff] %v787_v36 }
 0x3e5   :  { %792 = vst [vmem:[#allocation13 + $0x18] sm:$0xff] %v788_v37 }
 0x3e6   :  { %805 = dma.vmem_to_hbm [thread:$0]  %s798_s8, 512, %s800_s27, [#allocation4], %s1031_s21, %s1031_s21, %s1032_s22  }
 0x3e7   :  { %1028 = dma.done.wait [#allocation4], 512  }
 0x3e8   :  { %1029 = vsyncadd [#allocation4], 4294966784 }
 0x3e9   :  { %810 = vsyncpa [#allocation3], 1 }
 0x3ea   :  { %811 = vsyncpa [#allocation6], 1 }
 0x3eb   :  { %812 = vsyncpa [#allocation9], 1 }
 0x3ec   :  { %813 = vsyncpa [#allocation12], 1 }
 0x3ed   :  { %814 = vsyncpa [#allocation4], 1 }

</bundles_post_ra>
